<compile_context>
chip_gen: v5e
topology: v5e:2x2
jax: 0.10.0
libtpu: 0.0.40
codegen_flags: <defaults>
</compile_context>

<pallas_src>
import math

import jax
import jax.numpy as jnp
from jax.experimental import pallas as pl
from jax.experimental.pallas import tpu as pltpu

LANE = 128     # vreg lane width
SUBLANE = 8    # f32 sublane count


def _round_up(n, m):
    return ((n + m - 1) // m) * m


def dqn_mlp_kernel(x_ref, w1_ref, b1_ref, w2_ref, b2_ref, w3_ref, b3_ref, o_ref):
    # Layer 1: cast x to bf16 in-kernel (MXU operand), accumulate in f32,
    # bias + ReLU epilogue in f32 (v5e-safe, matches reference numerics).
    x = x_ref[...].astype(jnp.bfloat16)
    h = jnp.dot(x, w1_ref[...], preferred_element_type=jnp.float32)
    h = jnp.maximum(h + b1_ref[...], 0.0)
    # Layer 2
    h = jnp.dot(h.astype(jnp.bfloat16), w2_ref[...],
                preferred_element_type=jnp.float32)
    h = jnp.maximum(h + b2_ref[...], 0.0)
    # Layer 3 (no activation); output last dim is the real n_actions.
    out = jnp.dot(h.astype(jnp.bfloat16), w3_ref[...],
                  preferred_element_type=jnp.float32)
    o_ref[...] = (out + b3_ref[...]).astype(o_ref.dtype)


def init_params(key, n_observations, n_actions, hidden=128):
    """Matches PyTorch nn.Linear default init: U(-1/sqrt(fan_in), 1/sqrt(fan_in)).
    Weights stored transposed vs PyTorch, i.e. (in_features, out_features)."""
    def linear(k, fan_in, fan_out):
        kw, kb = jax.random.split(k)
        bound = 1.0 / math.sqrt(fan_in)
        w = jax.random.uniform(kw, (fan_in, fan_out), jnp.float32, -bound, bound)
        b = jax.random.uniform(kb, (1, fan_out), jnp.float32, -bound, bound)
        return w, b

    k1, k2, k3 = jax.random.split(key, 3)
    w1, b1 = linear(k1, n_observations, hidden)
    w2, b2 = linear(k2, hidden, hidden)
    w3, b3 = linear(k3, hidden, n_actions)
    return {"w1": w1, "b1": b1, "w2": w2, "b2": b2, "w3": w3, "b3": b3}


def prepare_params(params):
    """One-time cast of MXU operands to bf16 (biases stay f32).
    No padding needed: n_obs / n_actions blocks use the full array dim,
    which is always a legal block shape.  Call once, reuse every step."""
    hidden = params["w2"].shape[0]
    assert hidden % LANE == 0, "hidden dim must be a multiple of 128 (it is 128 for DQNnet)"
    return {
        "w1": params["w1"].astype(jnp.bfloat16),
        "b1": params["b1"].astype(jnp.float32),
        "w2": params["w2"].astype(jnp.bfloat16),
        "b2": params["b2"].astype(jnp.float32),
        "w3": params["w3"].astype(jnp.bfloat16),
        "b3": params["b3"].astype(jnp.float32),
    }


def _choose_batch_tiling(B, *, batch_tile=512, min_steps=4):
    """Return (tb, b_pad).

    Tiny batches (RL action selection) collapse to a single 8..32-row tile.
    Larger batches get >= min_steps grid steps (pipelining; lets v7x shard the
    'parallel' batch axis across its two TensorCores) with tiles capped at
    batch_tile rows (512 is at/near the measured v6e HBM-roofline knee)."""
    b8 = _round_up(B, SUBLANE)
    if b8 <= min_steps * SUBLANE:
        return b8, b8
    steps = max(min_steps, pl.cdiv(b8, batch_tile))
    tb = min(batch_tile, _round_up(pl.cdiv(B, steps), SUBLANE))
    b_pad = _round_up(B, tb)
    return tb, b_pad


def dqn_forward(x, prep, *, batch_tile=512, min_steps=4):
    """x: (B, n_obs) f32.  prep: output of prepare_params.  Returns (B, n_actions) f32."""
    B, n_obs = x.shape
    hidden = prep["w2"].shape[0]
    n_actions = prep["w3"].shape[1]
    assert prep["w1"].shape == (n_obs, hidden)

    tb, b_pad = _choose_batch_tiling(B, batch_tile=batch_tile, min_steps=min_steps)
    if b_pad != B:
        # Batch-dim-only zero pad (rare; at most tb-1 rows).  No K/N padding.
        x = jnp.pad(x, ((0, b_pad - B), (0, 0)))

    grid = (b_pad // tb,)
    stream = lambda shape: pl.BlockSpec(shape, lambda i: (i, 0))     # x / out
    resident = lambda shape: pl.BlockSpec(shape, lambda i: (0, 0))   # weights/biases

    param_bytes = sum(int(v.size) * v.dtype.itemsize for v in prep.values())
    cost = pl.CostEstimate(
        flops=2 * b_pad * hidden * (n_obs + hidden + n_actions),
        transcendentals=0,
        bytes_accessed=int(x.size) * x.dtype.itemsize
                       + param_bytes
                       + b_pad * n_actions * 4,
    )

    out = pl.pallas_call(
        dqn_mlp_kernel,
        out_shape=jax.ShapeDtypeStruct((b_pad, n_actions), jnp.float32),
        grid=grid,
        in_specs=[
            stream((tb, n_obs)),            # x   (f32, cast in-kernel)
            resident((n_obs, hidden)),      # w1  (bf16)
            resident((1, hidden)),          # b1  (f32)
            resident((hidden, hidden)),     # w2  (bf16)
            resident((1, hidden)),          # b2  (f32)
            resident((hidden, n_actions)),  # w3  (bf16)
            resident((1, n_actions)),       # b3  (f32)
        ],
        out_specs=stream((tb, n_actions)),
        compiler_params=pltpu.CompilerParams(
            dimension_semantics=("parallel",)),
        cost_estimate=cost,
    )(x, prep["w1"], prep["b1"], prep["w2"], prep["b2"], prep["w3"], prep["b3"])

    return out if b_pad == B else out[:B]


def reference_forward(x, p):
    """Pure-JAX reference with the same bf16 rounding of matmul operands."""
    q = lambda a: a.astype(jnp.bfloat16).astype(jnp.float32)
    h = jax.nn.relu(q(x) @ q(p["w1"]) + p["b1"])
    h = jax.nn.relu(q(h) @ q(p["w2"]) + p["b2"])
    return q(h) @ q(p["w3"]) + p["b3"]


if __name__ == "__main__":
    key = jax.random.PRNGKey(0)
    n_observations, n_actions = 32, 8

    kx, kp, kx2 = jax.random.split(key, 3)
    params = init_params(kp, n_observations, n_actions)
    prep = prepare_params(params)

    fwd = jax.jit(dqn_forward)

    # Tiny RL action-selection batch: single 8-row tile, no padding/slicing.
    x_small = jax.random.normal(kx, (8, n_observations), jnp.float32)
    out_small = jax.block_until_ready(fwd(x_small, prep))
    ref_small = reference_forward(x_small, params)
    assert out_small.shape == (8, n_actions)
    assert jnp.allclose(out_small, ref_small, atol=1e-3, rtol=1e-3), \
        "small-batch mismatch vs JAX reference"

    # Ragged medium batch: multi-step grid + batch-only padding + row slice.
    x_med = jax.random.normal(kx2, (40, n_observations), jnp.float32)
    out_med = jax.block_until_ready(fwd(x_med, prep))
    ref_med = reference_forward(x_med, params)
    assert out_med.shape == (40, n_actions)
    assert jnp.allclose(out_med, ref_med, atol=1e-3, rtol=1e-3), \
        "medium-batch mismatch vs JAX reference"

    print("KERNEL_OK")
</pallas_src>

<mosaic_0001>
module attributes {stable_mosaic.version = 11 : i64} {
  func.func @dqn_mlp_kernel(%arg0: i32, %arg1: memref<8x32xf32, #tpu.memory_space<vmem>>, %arg2: memref<32x128xbf16, #tpu.memory_space<vmem>>, %arg3: memref<1x128xf32, #tpu.memory_space<vmem>>, %arg4: memref<128x128xbf16, #tpu.memory_space<vmem>>, %arg5: memref<1x128xf32, #tpu.memory_space<vmem>>, %arg6: memref<128x8xbf16, #tpu.memory_space<vmem>>, %arg7: memref<1x8xf32, #tpu.memory_space<vmem>>, %arg8: memref<8x8xf32, #tpu.memory_space<vmem>>) attributes {dimension_semantics = [#tpu.dimension_semantics<parallel>], iteration_bounds = array<i64: 1>, scalar_prefetch = 0 : i64, scratch_operands = 0 : i64, tpu.core_type = #tpu.core_type<tc>, window_params = [{transform_indices = @transform_0, window_bounds = array<i64: 8, 32>}, {pipeline_mode = #tpu.pipeline_mode<synchronous>, transform_indices = @transform_1, window_bounds = array<i64: 32, 128>}, {pipeline_mode = #tpu.pipeline_mode<synchronous>, transform_indices = @transform_2, window_bounds = array<i64: 1, 128>}, {pipeline_mode = #tpu.pipeline_mode<synchronous>, transform_indices = @transform_3, window_bounds = array<i64: 128, 128>}, {pipeline_mode = #tpu.pipeline_mode<synchronous>, transform_indices = @transform_4, window_bounds = array<i64: 1, 128>}, {pipeline_mode = #tpu.pipeline_mode<synchronous>, transform_indices = @transform_5, window_bounds = array<i64: 128, 8>}, {pipeline_mode = #tpu.pipeline_mode<synchronous>, transform_indices = @transform_6, window_bounds = array<i64: 1, 8>}, {transform_indices = @transform_7, window_bounds = array<i64: 8, 8>}]} {
    %c0 = arith.constant 0 : index
    %c0_0 = arith.constant 0 : index
    %0 = vector.load %arg1[%c0, %c0_0] : memref<8x32xf32, #tpu.memory_space<vmem>>, vector<8x32xf32>
    %1 = arith.truncf %0 : vector<8x32xf32> to vector<8x32xbf16>
    %c0_1 = arith.constant 0 : index
    %c0_2 = arith.constant 0 : index
    %2 = vector.load %arg2[%c0_1, %c0_2] : memref<32x128xbf16, #tpu.memory_space<vmem>>, vector<32x128xbf16>
    %cst = arith.constant dense<0.000000e+00> : vector<8x128xf32>
    %3 = tpu.matmul %1, %2, %cst {dimension_numbers = #tpu.dot_dimension_numbers<[1], [0], [0], [1], [0, 0, 1, 1], [], []>} : vector<8x32xbf16>, vector<32x128xbf16>, vector<8x128xf32> -> vector<8x128xf32>
    %c0_3 = arith.constant 0 : index
    %c0_4 = arith.constant 0 : index
    %4 = vector.load %arg3[%c0_3, %c0_4] : memref<1x128xf32, #tpu.memory_space<vmem>>, vector<1x128xf32>
    %5 = vector.broadcast %4 : vector<1x128xf32> to vector<8x128xf32>
    %6 = arith.addf %3, %5 : vector<8x128xf32>
    %cst_5 = arith.constant 0.000000e+00 : f32
    %7 = vector.broadcast %cst_5 : f32 to vector<8x128xf32>
    %8 = arith.maximumf %6, %7 : vector<8x128xf32>
    %9 = arith.truncf %8 : vector<8x128xf32> to vector<8x128xbf16>
    %c0_6 = arith.constant 0 : index
    %c0_7 = arith.constant 0 : index
    %10 = vector.load %arg4[%c0_6, %c0_7] : memref<128x128xbf16, #tpu.memory_space<vmem>>, vector<128x128xbf16>
    %cst_8 = arith.constant dense<0.000000e+00> : vector<8x128xf32>
    %11 = tpu.matmul %9, %10, %cst_8 {dimension_numbers = #tpu.dot_dimension_numbers<[1], [0], [0], [1], [0, 0, 1, 1], [], []>} : vector<8x128xbf16>, vector<128x128xbf16>, vector<8x128xf32> -> vector<8x128xf32>
    %c0_9 = arith.constant 0 : index
    %c0_10 = arith.constant 0 : index
    %12 = vector.load %arg5[%c0_9, %c0_10] : memref<1x128xf32, #tpu.memory_space<vmem>>, vector<1x128xf32>
    %13 = vector.broadcast %12 : vector<1x128xf32> to vector<8x128xf32>
    %14 = arith.addf %11, %13 : vector<8x128xf32>
    %cst_11 = arith.constant 0.000000e+00 : f32
    %15 = vector.broadcast %cst_11 : f32 to vector<8x128xf32>
    %16 = arith.maximumf %14, %15 : vector<8x128xf32>
    %17 = arith.truncf %16 : vector<8x128xf32> to vector<8x128xbf16>
    %c0_12 = arith.constant 0 : index
    %c0_13 = arith.constant 0 : index
    %18 = vector.load %arg6[%c0_12, %c0_13] : memref<128x8xbf16, #tpu.memory_space<vmem>>, vector<128x8xbf16>
    %cst_14 = arith.constant dense<0.000000e+00> : vector<8x8xf32>
    %19 = tpu.matmul %17, %18, %cst_14 {dimension_numbers = #tpu.dot_dimension_numbers<[1], [0], [0], [1], [0, 0, 1, 1], [], []>} : vector<8x128xbf16>, vector<128x8xbf16>, vector<8x8xf32> -> vector<8x8xf32>
    %c0_15 = arith.constant 0 : index
    %c0_16 = arith.constant 0 : index
    %20 = vector.load %arg7[%c0_15, %c0_16] : memref<1x8xf32, #tpu.memory_space<vmem>>, vector<1x8xf32>
    %21 = vector.broadcast %20 : vector<1x8xf32> to vector<8x8xf32>
    %22 = arith.addf %19, %21 : vector<8x8xf32>
    %c0_17 = arith.constant 0 : index
    %c0_18 = arith.constant 0 : index
    %23 = vector.load %arg8[%c0_17, %c0_18] : memref<8x8xf32, #tpu.memory_space<vmem>>, vector<8x8xf32>
    tpu.vector_store %arg8[%c0_17, %c0_18], %22 {strides = array<i32>} : memref<8x8xf32, #tpu.memory_space<vmem>>, vector<8x8xf32>,
    return
  }
  func.func @transform_0(%arg0: i32) -> (i32, i32) {
    %c0_i32 = arith.constant 0 : i32
    %c0_i32_0 = arith.constant 0 : i32
    return %arg0, %c0_i32 : i32, i32
  }
  func.func @transform_1(%arg0: i32) -> (i32, i32) {
    %c0_i32 = arith.constant 0 : i32
    %c0_i32_0 = arith.constant 0 : i32
    %c0_i32_1 = arith.constant 0 : i32
    return %c0_i32, %c0_i32_0 : i32, i32
  }
  func.func @transform_2(%arg0: i32) -> (i32, i32) {
    %c0_i32 = arith.constant 0 : i32
    %c0_i32_0 = arith.constant 0 : i32
    %c0_i32_1 = arith.constant 0 : i32
    return %c0_i32, %c0_i32_0 : i32, i32
  }
  func.func @transform_3(%arg0: i32) -> (i32, i32) {
    %c0_i32 = arith.constant 0 : i32
    %c0_i32_0 = arith.constant 0 : i32
    %c0_i32_1 = arith.constant 0 : i32
    return %c0_i32, %c0_i32_0 : i32, i32
  }
  func.func @transform_4(%arg0: i32) -> (i32, i32) {
    %c0_i32 = arith.constant 0 : i32
    %c0_i32_0 = arith.constant 0 : i32
    %c0_i32_1 = arith.constant 0 : i32
    return %c0_i32, %c0_i32_0 : i32, i32
  }
  func.func @transform_5(%arg0: i32) -> (i32, i32) {
    %c0_i32 = arith.constant 0 : i32
    %c0_i32_0 = arith.constant 0 : i32
    %c0_i32_1 = arith.constant 0 : i32
    return %c0_i32, %c0_i32_0 : i32, i32
  }
  func.func @transform_6(%arg0: i32) -> (i32, i32) {
    %c0_i32 = arith.constant 0 : i32
    %c0_i32_0 = arith.constant 0 : i32
    %c0_i32_1 = arith.constant 0 : i32
    return %c0_i32, %c0_i32_0 : i32, i32
  }
  func.func @transform_7(%arg0: i32) -> (i32, i32) {
    %c0_i32 = arith.constant 0 : i32
    %c0_i32_0 = arith.constant 0 : i32
    return %arg0, %c0_i32 : i32, i32
  }
}

</mosaic_0001>

<bundles_post_ra>
// kernel: dqn_forward.1
= control target key start
LH: loop header
LB: loop body
LE: loop exit
PB: predicated region body
PF: predicated region fallthrough
CT: control target
= control target key end

     0   :  { %12 = vsyncpa [#allocation3], 0  ;;  %s653_s0 = inlined_call_operand.vmem [shape: f32[8,32], index: 0, kind: input, shape index: {}]   ;;  %s654_s1 = inlined_call_operand.hbm [shape: bf16[32,128], index: 1, kind: input, shape index: {}]   ;;  %s655_s2 = inlined_call_operand.hbm [shape: f32[1,128], index: 2, kind: input, shape index: {}]   ;;  %s656_s3 = inlined_call_operand.vmem [shape: bf16[128,128], index: 3, kind: input, shape index: {}]   ;;  %s657_s4 = inlined_call_operand.hbm [shape: f32[1,128], index: 4, kind: input, shape index: {}]   ;;  %s658_s5 = inlined_call_operand.vmem [shape: bf16[128,8], index: 5, kind: input, shape index: {}]   ;;  %s659_s6 = inlined_call_operand.hbm [shape: f32[1,8], index: 6, kind: input, shape index: {}]   ;;  %s660_s7 = inlined_call_operand.hbm [shape: f32[8,8], index: 7, kind: output, shape index: {}]  }
   0x1   :  { %13 = vsyncpa [#allocation6], 0 }
   0x2   :  { %14 = vsyncpa [#allocation9], 0  ;;  %s36_s26 = sshll.u32 %s655_s2, 4  ;;  %s37_s26 = int_to_ptr.hbm [resolvable:$true] %s36_s26 }
   0x3   :  { %15 = vsyncpa [#allocation4], 0  ;;  %s540_s27 = smov [#allocation5]   ;;  %s22_s8 = sshll.u32 %s654_s1, 4  ;;  %s23_s8 = int_to_ptr.hbm [resolvable:$true] %s22_s8 }
   0x4   :  { %s38_s28 = sshll.u32 %s540_s27, 4  ;;  %s541_s9 = smov [#allocation2]   ;;  %s39_s28 = int_to_ptr.vmem [resolvable:$true] %s38_s28 }
   0x5   :  { %41 = dma.hbm_to_vmem [thread:$0]  %s37_s26, 16, %s39_s28, [#allocation6]  }
   0x6   :  { %s24_s10 = sshll.u32 %s541_s9, 4  ;;  %s542_s11 = smov 64   ;;  %s25_s10 = int_to_ptr.vmem [resolvable:$true] %s24_s10 }
   0x7   :  { %s543_s12 = smov 4   ;;  %s49_s2 = sshll.u32 %s657_s4, 4  ;;  %s50_s2 = int_to_ptr.hbm [resolvable:$true] %s49_s2 }
   0x8   :  { %30 = dma.hbm_to_vmem [thread:$0]  %s23_s8, 256, %s25_s10, [#allocation3], %s542_s11, %s542_s11, %s543_s12  }
   0x9   :  { %s544_s15 = smov [#allocation7]   ;;  %s62_s1 = sshll.u32 %s659_s6, 4  ;;  %s63_s1 = int_to_ptr.hbm [resolvable:$true] %s62_s1 }
   0xa   :  { %s51_s16 = sshll.u32 %s544_s15, 4  ;;  %s545_s19 = smov [#allocation8]   ;;  %s52_s16 = int_to_ptr.vmem [resolvable:$true] %s51_s16 }
   0xb   :  { %54 = dma.hbm_to_vmem [thread:$0]  %s50_s2, 16, %s52_s16, [#allocation6]  }
   0xc   :  { %s64_s20 = sshll.u32 %s545_s19, 4  ;;  %s65_s20 = int_to_ptr.vmem [resolvable:$true] %s64_s20 }
   0xd   :  { %67 = dma.hbm_to_vmem [thread:$0]  %s63_s1, 16, %s65_s20, [#allocation9]  }
   0xe   :  { %532 = dma.done.wait [#allocation3], 256  }
   0xf   :  { %533 = vsyncadd [#allocation3], 4294967040 }
  0x10   :  { %534 = dma.done.wait [#allocation6], 32  }
  0x11   :  { %535 = vsyncadd [#allocation6], 4294967264 }
  0x12   :  { %536 = dma.done.wait [#allocation9], 16  }
  0x13   :  { %537 = vsyncadd [#allocation9], 4294967280  ;;  %v385_v0 = vld [vmem:[#allocation2 + $0x8] sm:$0xff]  ;;  %v393_v1 = vld [vmem:[%s656_s3 + $0x38] sm:$0xff]  ;;  %vm107_vm0 = vcmask 261120   ;;  %s546_s24 = smov [#allocation10]  }
  0x14   :  { %117 = vmatpush.bf16.msra.mxu0 %v385_v0  ;;  %v384_v2 = vld [vmem:[#allocation2] sm:$0xff]  ;;  %194 = vmatpush.bf16.msra.mxu1 %v393_v1  ;;  %v392_v4 = vld [vmem:[%s656_s3 + $0x30] sm:$0xff]  ;;  %v391_v6 = vld [vmem:[%s656_s3 + $0x28] sm:$0xff]  ;;  %s297_s25 = sshll.u32 %s546_s24, 4  ;;  %s299_s28 = sshll.u32 %s660_s7, 4  ;;  %vm290_vm1 = vcmask 64512   ;;  %s298_s25 = int_to_ptr.vmem [resolvable:$true] %s297_s25  ;;  %s300_s28 = int_to_ptr.hbm [resolvable:$true] %s299_s28 }
  0x15   :  { %v85_v3 = vld [vmem:[%s653_s0] sm:$0xff]  ;;  %v389_v8 = vld [vmem:[%s656_s3 + $0x18] sm:$0xff]  ;;  %v388_v9 = vld [vmem:[%s656_s3 + $0x10] sm:$0xff] }
  0x16   :  { %v86_v5 = vpack.c.bf16 %v85_v3, %v85_v3  ;;  %v390_v7 = vld [vmem:[%s656_s3 + $0x20] sm:$0xff]  ;;  %v387_v10 = vld [vmem:[%s656_s3 + $0x8] sm:$0xff]  ;;  %v401_v12 = vld [vmem:[%s658_s5 + $0x38] sm:$0xff] }
  0x17   :  { %v386_v11 = vld [vmem:[%s656_s3] sm:$0xff]  ;;  %277 = vmatpush.bf16.msra.mxu2 %v401_v12  ;;  %v400_v13 = vld [vmem:[%s658_s5 + $0x30] sm:$0xff]  ;;  %v399_v14 = vld [vmem:[%s658_s5 + $0x28] sm:$0xff] }
  0x18   :  { %118 = vmatpush.bf16.msra.mxu0 %v384_v2  ;;  %195 = vmatpush.bf16.msra.mxu1 %v392_v4  ;;  %v398_v15 = vld [vmem:[%s658_s5 + $0x20] sm:$0xff]  ;;  %v397_v16 = vld [vmem:[%s658_s5 + $0x18] sm:$0xff]  ;;  %v396_v17 = vld [vmem:[%s658_s5 + $0x10] sm:$0xff] }
  0x19   :  { %v409_v18 = vld [vmem:[#allocation5] ss:$0 sm:$0xff]  ;;  %v395_v24 = vld [vmem:[%s658_s5 + $0x8] sm:$0xff]  ;;  %v394_v25 = vld [vmem:[%s658_s5] sm:$0xff] }
  0x1a   :  { %v410_v26 = vld [vmem:[#allocation7] ss:$0 sm:$0xff]  ;;  %v411_v32 = vld [vmem:[#allocation8] ss:$0 sm:$0xff] }
  0x1b   :  { %319 = vmatmul.msk.bf16.vlgmr.msra.gmra.mxu0 %vm107_vm0, %v86_v5  ;;  %278 = vmatpush.bf16.msra.mxu2 %v400_v13 }
  0x1c   :  { %196 = vmatpush.bf16.msra.mxu1 %v391_v6 }
  0x1f   :  { %279 = vmatpush.bf16.msra.mxu2 %v399_v14 }
  0x20   :  { %197 = vmatpush.bf16.msra.mxu1 %v390_v7 }
  0x23   :  { %280 = vmatpush.bf16.msra.mxu2 %v398_v15 }
  0x24   :  { %198 = vmatpush.bf16.msra.mxu1 %v389_v8 }
  0x27   :  { %281 = vmatpush.bf16.msra.mxu2 %v397_v16 }
  0x28   :  { %199 = vmatpush.bf16.msra.mxu1 %v388_v9 }
  0x2b   :  { %282 = vmatpush.bf16.msra.mxu2 %v396_v17 }
  0x2c   :  { %200 = vmatpush.bf16.msra.mxu1 %v387_v10 }
  0x2f   :  { %283 = vmatpush.bf16.msra.mxu2 %v395_v24 }
  0x30   :  { %201 = vmatpush.bf16.msra.mxu1 %v386_v11 }
  0x33   :  { %284 = vmatpush.bf16.msra.mxu2 %v394_v25 }
  0x98   :  { %v120_v19 = vpop.f32.mrf.mxu0 }
  0x99   :  { %v121_v20 = vadd.f32 %v409_v18, %v120_v19 }
  0x9b   :  { %v124_v21 = vmax.f32 %v121_v20, 0.0 }
  0x9d   :  { %v125_v22 = vpack.c.bf16 %v124_v21, %v124_v21 }
  0x9f   :  { %202 = vmatmul.bf16.vlgmr.msra.gmra.mxu1 %v125_v22 }
  0xa0   :  { %v122_v23 = vpop.f32.mrf.mxu0 }
 0x11c   :  { %v203_v27 = vpop.f32.mrf.mxu1 }
 0x11d   :  { %v204_v28 = vadd.f32 %v410_v26, %v203_v27 }
 0x11f   :  { %v207_v29 = vmax.f32 %v204_v28, 0.0 }
 0x121   :  { %v208_v30 = vpack.c.bf16 %v207_v29, %v207_v29 }
 0x123   :  { %285 = vmatmul.bf16.vlgmr.msra.gmra.mxu2 %v208_v30 }
 0x124   :  { %v205_v31 = vpop.f32.mrf.mxu1 }
 0x1a6   :  { %v286_v33 = vpop.f32.mrf.mxu2 }
 0x1a7   :  { %v287_v34 = vadd.f32 %v411_v32, %v286_v33 }
 0x1a9   :  { %291 = vst.msk [vmem:[#allocation10] sm:$0xff] %vm290_vm1, %v287_v34 }
 0x1aa   :  { %302 = dma.vmem_to_hbm [thread:$0]  %s298_s25, 128, %s300_s28, [#allocation4]  }
 0x1ae   :  { %v288_v35 = vpop.f32.mrf.mxu2 }
 0x1af   :  { %538 = dma.done.wait [#allocation4], 128  }
 0x1b0   :  { %539 = vsyncadd [#allocation4], 4294967168 }
 0x1b1   :  { %307 = vsyncpa [#allocation3], 1 }
 0x1b2   :  { %308 = vsyncpa [#allocation6], 1 }
 0x1b3   :  { %309 = vsyncpa [#allocation9], 1 }
 0x1b4   :  { %310 = vsyncpa [#allocation4], 1 }

</bundles_post_ra>
